<compile_context>
chip_gen: v6e
topology: v6e:2x2x1
jax: 0.10.0
libtpu: 0.0.40
codegen_flags: <defaults>
</compile_context>

<pallas_src>
import math
import functools

import jax
import jax.numpy as jnp
from jax import lax
from jax.experimental import pallas as pl
from jax.experimental.pallas import tpu as pltpu


MASK_VALUE = -1e30                       # finite "minus infinity"
VMEM_LIMIT = 48 * 1024 * 1024            # fits v5e/v6e (128 MiB) and v7x (64 MiB)


# ---------------------------------------------------------------------------
# Stage 1: fused QKV projection (packed lane-dense K||V output)
# ---------------------------------------------------------------------------
def qkv_proj_kernel(x_ref, wqkv_ref, bqkv_ref, q_ref, kv_ref, *, dim_model, scale):
    """x_ref: (bp, D); wqkv_ref: (D, D+2*dh) bf16; bqkv_ref: (1, D+2*dh) f32.

    Outputs (bf16): q_ref (bp, D) pre-scaled by 1/sqrt(dh),
                    kv_ref (bp, 2*dh) = [K || V] packed lane-dense.
    """
    D = dim_model
    x = x_ref[...].astype(jnp.bfloat16)
    qkv = jnp.dot(x, wqkv_ref[...],
                  preferred_element_type=jnp.float32) + bqkv_ref[...]
    q_ref[...] = (qkv[:, :D] * scale).astype(jnp.bfloat16)   # fold attn scale
    kv_ref[...] = (qkv[:, D:]).astype(jnp.bfloat16)          # K||V packed


# ---------------------------------------------------------------------------
# Stage 2: causal flash MQA (triangular in-kernel kv loop) + fused out proj
# ---------------------------------------------------------------------------
def flash_mqa_kernel(q_ref, kv_ref, wout_ref, bout_ref, o_ref, *,
                     num_heads, dim_head, block_q, block_k):
    """One (batch, q-tile) grid step.

    q_ref   : (TQ, D)      bf16 (pre-scaled)
    kv_ref  : (S, 2*dh)    bf16, full per-batch K||V resident in VMEM
    wout_ref: (D, D)       bf16        bout_ref: (1, D) f32
    o_ref   : (TQ, D)      bf16
    """
    H, dh, TQ, TK = num_heads, dim_head, block_q, block_k
    D = H * dh
    qi = pl.program_id(1)
    q_start = qi * TQ

    # Flatten the head axis once per q tile; reused across the whole kv loop.
    q = q_ref[...].reshape(TQ * H, dh)                       # (TQ*H, dh) bf16

    # Causal kv-tile bounds: only lower-triangular tiles are ever touched.
    num_kv = ((qi + 1) * TQ + TK - 1) // TK                  # tiles needed
    num_full = (q_start + 1) // TK                           # fully-unmasked tiles

    def step(ki, carry, *, masked):
        m_prev, l_prev, acc_prev = carry
        start = pl.multiple_of(ki * TK, TK)
        kv = kv_ref[pl.ds(start, TK), :]                     # (TK, 2*dh) bf16
        k = kv[:, :dh]
        v = kv[:, dh:]

        # One large MXU contraction for all heads: (TQ*H, dh) x (TK, dh)^T.
        s = lax.dot_general(q, k, (((1,), (1,)), ((), ())),
                            preferred_element_type=jnp.float32)   # (TQ*H, TK)
        if masked:   # only diagonal-crossing tiles pay for the mask
            q_pos = q_start + lax.broadcasted_iota(jnp.int32, (TQ * H, TK), 0) // H
            k_pos = ki * TK + lax.broadcasted_iota(jnp.int32, (TQ * H, TK), 1)
            s = jnp.where(k_pos <= q_pos, s, MASK_VALUE)

        # Online softmax (f32 math).
        m_new = jnp.maximum(m_prev, jnp.max(s, axis=-1, keepdims=True))
        alpha = jnp.exp(m_prev - m_new)                      # (TQ*H, 1)
        p = jnp.exp(s - m_new)                               # (TQ*H, TK)
        l_new = alpha * l_prev + jnp.sum(p, axis=-1, keepdims=True)
        pv = jnp.dot(p.astype(jnp.bfloat16), v,
                     preferred_element_type=jnp.float32)     # (TQ*H, dh)
        acc_new = alpha * acc_prev + pv
        return m_new, l_new, acc_new

    carry = (jnp.full((TQ * H, 1), MASK_VALUE, dtype=jnp.float32),   # running max
             jnp.zeros((TQ * H, 1), dtype=jnp.float32),              # running denom
             jnp.zeros((TQ * H, dh), dtype=jnp.float32))             # accumulator
    carry = lax.fori_loop(0, num_full,
                          functools.partial(step, masked=False), carry)
    m_f, l_f, acc_f = lax.fori_loop(num_full, num_kv,
                                    functools.partial(step, masked=True), carry)

    # Finalize (reached right after the last causally-relevant kv tile) +
    # fused output projection, written back in bf16.
    inv_l = pl.reciprocal(l_f, approx=True)                  # EUP, ~free
    attn = (acc_f * inv_l).reshape(TQ, D).astype(jnp.bfloat16)
    o_ref[...] = (jnp.dot(attn, wout_ref[...],
                          preferred_element_type=jnp.float32)
                  + bout_ref[...]).astype(o_ref.dtype)


# ---------------------------------------------------------------------------
# Wrapper
# ---------------------------------------------------------------------------
def multiquery_attention(x, wqkv_t, bqkv, wout_t, bout, *,
                         num_heads, dim_head,
                         block_q=128, block_k=256, block_proj=512):
    B, S, D = x.shape
    assert D == num_heads * dim_head
    dh = dim_head
    d_qkv = D + 2 * dh

    bq = min(block_q, S)
    bk = min(block_k, S)
    bp = min(block_proj, S)
    assert S % bq == 0 and S % bk == 0 and S % bp == 0, \
        "seq_len must be divisible by the tile sizes"

    scale = 1.0 / math.sqrt(dh)

    # bf16 MXU inputs (f32 accumulation inside the kernels).
    wqkv_bf = wqkv_t.astype(jnp.bfloat16)
    wout_bf = wout_t.astype(jnp.bfloat16)
    bqkv2 = bqkv.reshape(1, d_qkv).astype(jnp.float32)
    bout2 = bout.reshape(1, D).astype(jnp.float32)

    # Constant-index operands (weights/biases) only need a single VMEM buffer.
    const1 = pl.Buffered(1)

    # ---- stage 1: fused QKV projection ------------------------------------
    proj_kernel = functools.partial(qkv_proj_kernel, dim_model=D, scale=scale)
    q, kv = pl.pallas_call(
        proj_kernel,
        out_shape=(
            jax.ShapeDtypeStruct((B, S, D), jnp.bfloat16),
            jax.ShapeDtypeStruct((B, S, 2 * dh), jnp.bfloat16),
        ),
        grid_spec=pltpu.PrefetchScalarGridSpec(
            num_scalar_prefetch=0,
            grid=(B, S // bp),
            in_specs=[
                pl.BlockSpec((pl.Squeezed(), bp, D), lambda b, i: (b, i, 0)),
                pl.BlockSpec((D, d_qkv), lambda b, i: (0, 0), pipeline_mode=const1),
                pl.BlockSpec((1, d_qkv), lambda b, i: (0, 0), pipeline_mode=const1),
            ],
            out_specs=[
                pl.BlockSpec((pl.Squeezed(), bp, D), lambda b, i: (b, i, 0)),
                pl.BlockSpec((pl.Squeezed(), bp, 2 * dh), lambda b, i: (b, i, 0)),
            ],
        ),
        compiler_params=pltpu.CompilerParams(
            dimension_semantics=("parallel", "parallel"),
            vmem_limit_bytes=VMEM_LIMIT),
    )(x, wqkv_bf, bqkv2)

    # ---- stage 2: causal flash MQA + fused output projection ---------------
    # TODO(synk): for very large D (>= ~2048) on v7x (64 MiB VMEM), tile the
    # fused output projection over output columns instead of keeping the full
    # (D, D) w_out resident.
    attn_kernel = functools.partial(
        flash_mqa_kernel, num_heads=num_heads, dim_head=dh,
        block_q=bq, block_k=bk)
    out = pl.pallas_call(
        attn_kernel,
        out_shape=jax.ShapeDtypeStruct((B, S, D), jnp.bfloat16),
        grid_spec=pltpu.PrefetchScalarGridSpec(
            num_scalar_prefetch=0,
            grid=(B, S // bq),
            in_specs=[
                pl.BlockSpec((pl.Squeezed(), bq, D), lambda b, qi: (b, qi, 0)),
                # Full per-batch K||V slab resident; re-fetched only when b changes.
                pl.BlockSpec((pl.Squeezed(), S, 2 * dh), lambda b, qi: (b, 0, 0)),
                pl.BlockSpec((D, D), lambda b, qi: (0, 0), pipeline_mode=const1),
                pl.BlockSpec((1, D), lambda b, qi: (0, 0), pipeline_mode=const1),
            ],
            out_specs=pl.BlockSpec((pl.Squeezed(), bq, D),
                                   lambda b, qi: (b, qi, 0)),
        ),
        compiler_params=pltpu.CompilerParams(
            dimension_semantics=("parallel", "parallel"),
            vmem_limit_bytes=VMEM_LIMIT),
    )(q, kv, wout_bf, bout2)
    return out


# ---------------------------------------------------------------------------
# Pure-JAX reference (replicates the PyTorch forward, padding_mask=None, eval)
# ---------------------------------------------------------------------------
def mqa_reference(x, wqkv_t, bqkv, wout_t, bout, *, num_heads, dim_head):
    B, S, D = x.shape
    qkv = x @ wqkv_t + bqkv
    q, k, v = jnp.split(qkv, [D, D + dim_head], axis=-1)
    q = q.reshape(B, S, num_heads, dim_head).transpose(0, 2, 1, 3)  # (B,H,S,dh)
    k = k[:, None, :, :]                                            # (B,1,S,dh)
    v = v[:, None, :, :]
    scores = jnp.einsum('bhqd,bhkd->bhqk', q, k) / math.sqrt(dim_head)
    causal = jnp.triu(jnp.ones((S, S), dtype=bool), 1)
    scores = jnp.where(causal[None, None], -jnp.inf, scores)
    attn = jax.nn.softmax(scores, axis=-1)
    out = jnp.einsum('bhqk,bhkd->bhqd', attn, v)
    out = out.transpose(0, 2, 1, 3).reshape(B, S, D)
    return out @ wout_t + bout


def xavier_uniform(key, out_features, in_features):
    bound = math.sqrt(6.0 / (in_features + out_features))
    return jax.random.uniform(key, (out_features, in_features),
                              dtype=jnp.float32, minval=-bound, maxval=bound)


def _run_case(key, *, batch, seq_len, num_heads, dim_head, **blocks):
    dim_model = num_heads * dim_head
    kx, kqkv, kout = jax.random.split(key, 3)

    x = jax.random.normal(kx, (batch, seq_len, dim_model), dtype=jnp.float32)
    # Parameter init mirroring the module: xavier_uniform weights, zero biases.
    w_qkv = xavier_uniform(kqkv, dim_model + 2 * dim_head, dim_model)  # (out, in)
    b_qkv = jnp.zeros((dim_model + 2 * dim_head,), dtype=jnp.float32)
    w_out = xavier_uniform(kout, dim_model, dim_model)                 # (out, in)
    b_out = jnp.zeros((dim_model,), dtype=jnp.float32)

    y = multiquery_attention(x, w_qkv.T, b_qkv, w_out.T, b_out,
                             num_heads=num_heads, dim_head=dim_head, **blocks)
    y = jax.block_until_ready(y)

    y_ref = mqa_reference(x, w_qkv.T, b_qkv, w_out.T, b_out,
                          num_heads=num_heads, dim_head=dim_head)

    assert y.shape == (batch, seq_len, dim_model)
    y32 = y.astype(jnp.float32)
    err = float(jnp.max(jnp.abs(y32 - y_ref)))
    # bf16 matmul inputs/output + approx reciprocal => looser tolerance.
    assert jnp.allclose(y32, y_ref, atol=5e-2, rtol=5e-2), f"max err {err}"
    return err


if __name__ == "__main__":
    key = jax.random.PRNGKey(0)
    k1, k2 = jax.random.split(key)

    # Small shapes consistent with the module: dim_model = num_heads * dim_head.
    _run_case(k1, batch=2, seq_len=8, num_heads=4, dim_head=8)

    # Multi-tile case exercising the triangular in-kernel kv loop
    # (several fully-unmasked tiles + a masked diagonal tile per q tile).
    _run_case(k2, batch=1, seq_len=256, num_heads=4, dim_head=32,
              block_q=64, block_k=64)

    # TODO(synk): attention dropout (dropout_p) is a no-op in eval mode and is
    # not implemented; the padding_mask branch (mask != None) is also omitted.
    print("KERNEL_OK")
</pallas_src>

<mosaic_0001>
module attributes {stable_mosaic.version = 11 : i64} {
  func.func @qkv_proj_kernel(%arg0: i32, %arg1: i32, %arg2: memref<1x8x32xf32, #tpu.memory_space<vmem>>, %arg3: memref<32x48xbf16, #tpu.memory_space<vmem>>, %arg4: memref<1x48xf32, #tpu.memory_space<vmem>>, %arg5: memref<1x8x32xbf16, #tpu.memory_space<vmem>>, %arg6: memref<1x8x16xbf16, #tpu.memory_space<vmem>>) attributes {dimension_semantics = [#tpu.dimension_semantics<parallel>, #tpu.dimension_semantics<parallel>], iteration_bounds = array<i64: 2, 1>, scalar_prefetch = 0 : i64, scratch_operands = 0 : i64, tpu.core_type = #tpu.core_type<tc>, window_params = [{transform_indices = @transform_0, window_bounds = array<i64: 1, 8, 32>}, {pipeline_mode = #tpu.pipeline_mode<synchronous>, transform_indices = @transform_1, window_bounds = array<i64: 32, 48>}, {pipeline_mode = #tpu.pipeline_mode<synchronous>, transform_indices = @transform_2, window_bounds = array<i64: 1, 48>}, {transform_indices = @transform_3, window_bounds = array<i64: 1, 8, 32>}, {transform_indices = @transform_4, window_bounds = array<i64: 1, 8, 16>}]} {
    %c0 = arith.constant 0 : index
    %c0_0 = arith.constant 0 : index
    %c0_1 = arith.constant 0 : index
    %0 = vector.load %arg2[%c0, %c0_0, %c0_1] : memref<1x8x32xf32, #tpu.memory_space<vmem>>, vector<1x8x32xf32>
    %1 = vector.shape_cast %0 : vector<1x8x32xf32> to vector<8x32xf32>
    %2 = arith.truncf %1 : vector<8x32xf32> to vector<8x32xbf16>
    %c0_2 = arith.constant 0 : index
    %c0_3 = arith.constant 0 : index
    %3 = vector.load %arg3[%c0_2, %c0_3] : memref<32x48xbf16, #tpu.memory_space<vmem>>, vector<32x48xbf16>
    %cst = arith.constant dense<0.000000e+00> : vector<8x48xf32>
    %4 = tpu.matmul %2, %3, %cst {dimension_numbers = #tpu.dot_dimension_numbers<[1], [0], [0], [1], [0, 0, 1, 1], [], []>} : vector<8x32xbf16>, vector<32x48xbf16>, vector<8x48xf32> -> vector<8x48xf32>
    %c0_4 = arith.constant 0 : index
    %c0_5 = arith.constant 0 : index
    %5 = vector.load %arg4[%c0_4, %c0_5] : memref<1x48xf32, #tpu.memory_space<vmem>>, vector<1x48xf32>
    %6 = vector.broadcast %5 : vector<1x48xf32> to vector<8x48xf32>
    %7 = arith.addf %4, %6 : vector<8x48xf32>
    %8 = vector.extract_strided_slice %7 {offsets = [0, 0], sizes = [8, 32], strides = [1, 1]} : vector<8x48xf32> to vector<8x32xf32>
    %cst_6 = arith.constant 0.353553385 : f32
    %9 = vector.broadcast %cst_6 : f32 to vector<8x32xf32>
    %10 = arith.mulf %8, %9 : vector<8x32xf32>
    %11 = arith.truncf %10 : vector<8x32xf32> to vector<8x32xbf16>
    %c0_7 = arith.constant 0 : index
    %c0_8 = arith.constant 0 : index
    %c0_9 = arith.constant 0 : index
    %12 = vector.load %arg5[%c0_7, %c0_8, %c0_9] : memref<1x8x32xbf16, #tpu.memory_space<vmem>>, vector<1x8x32xbf16>
    %13 = vector.shape_cast %12 : vector<1x8x32xbf16> to vector<8x32xbf16>
    %14 = vector.shape_cast %11 : vector<8x32xbf16> to vector<1x8x32xbf16>
    tpu.vector_store %arg5[%c0_7, %c0_8, %c0_9], %14 {strides = array<i32>} : memref<1x8x32xbf16, #tpu.memory_space<vmem>>, vector<1x8x32xbf16>,
    %15 = vector.extract_strided_slice %7 {offsets = [0, 32], sizes = [8, 16], strides = [1, 1]} : vector<8x48xf32> to vector<8x16xf32>
    %16 = arith.truncf %15 : vector<8x16xf32> to vector<8x16xbf16>
    %c0_10 = arith.constant 0 : index
    %c0_11 = arith.constant 0 : index
    %c0_12 = arith.constant 0 : index
    %17 = vector.load %arg6[%c0_10, %c0_11, %c0_12] : memref<1x8x16xbf16, #tpu.memory_space<vmem>>, vector<1x8x16xbf16>
    %18 = vector.shape_cast %17 : vector<1x8x16xbf16> to vector<8x16xbf16>
    %19 = vector.shape_cast %16 : vector<8x16xbf16> to vector<1x8x16xbf16>
    tpu.vector_store %arg6[%c0_10, %c0_11, %c0_12], %19 {strides = array<i32>} : memref<1x8x16xbf16, #tpu.memory_space<vmem>>, vector<1x8x16xbf16>,
    return
  }
  func.func @transform_0(%arg0: i32, %arg1: i32) -> (i32, i32, i32) {
    %c0_i32 = arith.constant 0 : i32
    %c0_i32_0 = arith.constant 0 : i32
    return %arg0, %arg1, %c0_i32 : i32, i32, i32
  }
  func.func @transform_1(%arg0: i32, %arg1: i32) -> (i32, i32) {
    %c0_i32 = arith.constant 0 : i32
    %c0_i32_0 = arith.constant 0 : i32
    %c0_i32_1 = arith.constant 0 : i32
    return %c0_i32, %c0_i32_0 : i32, i32
  }
  func.func @transform_2(%arg0: i32, %arg1: i32) -> (i32, i32) {
    %c0_i32 = arith.constant 0 : i32
    %c0_i32_0 = arith.constant 0 : i32
    %c0_i32_1 = arith.constant 0 : i32
    return %c0_i32, %c0_i32_0 : i32, i32
  }
  func.func @transform_3(%arg0: i32, %arg1: i32) -> (i32, i32, i32) {
    %c0_i32 = arith.constant 0 : i32
    %c0_i32_0 = arith.constant 0 : i32
    return %arg0, %arg1, %c0_i32 : i32, i32, i32
  }
  func.func @transform_4(%arg0: i32, %arg1: i32) -> (i32, i32, i32) {
    %c0_i32 = arith.constant 0 : i32
    %c0_i32_0 = arith.constant 0 : i32
    return %arg0, %arg1, %c0_i32 : i32, i32, i32
  }
}

</mosaic_0001>

<bundles_post_ra>
// kernel: tpu_custom_call.1
= control target key start
LH: loop header
LB: loop body
LE: loop exit
PB: predicated region body
PF: predicated region fallthrough
CT: control target
= control target key end

     0   :  { %s1029_s0 = inlined_call_operand.hbm [shape: f32[2,8,32], index: 0, kind: input, shape index: {}]   ;;  %s1030_s1 = inlined_call_operand.hbm [shape: bf16[32,48], index: 1, kind: input, shape index: {}]   ;;  %s1031_s2 = inlined_call_operand.vmem [shape: f32[1,48], index: 2, kind: input, shape index: {}]   ;;  %s1032_s3 = inlined_call_operand.hbm [shape: bf16[2,8,32], index: 3, kind: output, shape index: {0}]   ;;  %s1033_s4 = inlined_call_operand.hbm [shape: bf16[2,8,16], index: 4, kind: output, shape index: {1}]  }
   0x1   :  { %1035 = sst [smem:[#allocation14_spill]] %s1030_s1 }
   0x2   :  { %10 = vsyncpa [#allocation3], 0 }
   0x3   :  { %12 = vsyncpa [#allocation3 + $0x1], 0 }
   0x4   :  { %13 = vsyncpa [#allocation6], 0 }
   0x5   :  { %14 = vsyncpa [#allocation4], 0 }
   0x6   :  { %16 = vsyncpa [#allocation4 + $0x1], 0 }
   0x7   :  { %17 = vsyncpa [#allocation9], 0 }
   0x8   :  { %19 = vsyncpa [#allocation9 + $0x1], 0  ;;  %s822_s15 = smov 0   ;;  %s824_s16 = smov 0  }
   0x9   :  { %s826_s17 = smov 0   ;;  %s828_s18 = smov 0  }
   0xa   :  { %s830_s19 = smov 0   ;;  %s832_s20 = smov 0  }
   0xb LB: > { %s498_s21 = sadd.s32 4294967295, %s786_s20   ;;  %s499_s22 = sadd.s32 4294967294, %s786_s20   ;;  %s786_s20 = sphi %s832_s20, %s25_s20   ;;  %s782_s19 = sphi %s830_s19, %s1053_s19   ;;  %s778_s18 = sphi %s828_s18, %s1052_s18   ;;  %s774_s17 = sphi %s826_s17, %s1051_s17   ;;  %s770_s16 = sphi %s824_s16, %s1050_s16   ;;  %s766_s15 = sphi %s822_s15, %s1049_s15  }
   0xc   : > { %p59_p0 = scmp.ne.s32.totalorder %s770_s16, %s766_s15  ;;  %p856_p1 = scmp.eq.s32.totalorder %s498_s21, 0 }
   0xd   : > { %p860_p2 = scmp.eq.s32.totalorder %s498_s21, 1  ;;  %p133_p3 = scmp.eq.s32.totalorder %s499_s22, 1 }
   0xe   : > { %p866_p4 = por %p856_p1, %p59_p0  ;;  %p500_p5 = scmp.ge.s32.totalorder %s786_s20, 1 }
   0xf   : > { %p871_p6 = por %p133_p3, %p59_p0  ;;  %p168_p7 = scmp.lt.s32.totalorder %s786_s20, 3 }
  0x10   : > { %s1038_s25 = scalar_select %p866_p4, 1, 0 }
  0x11   : > { %s1039_s26 = scalar_select %p871_p6, 1, 0 }
  0x12   : > { %p876_p8 = pnand %p500_p5, %p168_p7  ;;  %s788_s28 = smov [#allocation5]  }
  0x13   : > { %s180_s29 = sshll.u32 %s788_s28, 4  ;;  %s37_s5 = sadd.s32 1, %s782_s19  ;;  %s181_s29 = int_to_ptr.vmem [resolvable:$true] %s180_s29 }
  0x14   : > { %p543_p9 = pneg %p876_p8  ;;  %s629_s6 = scalar_lea.vmem %s181_s29, 256 }
  0x15   : > { %p630_p13 = scmp.ne.s32.totalorder %s181_s29, %s629_s6  ;;  %p637_p5 = scmp.lt.s32.totalorder %s181_s29, %s181_s29 }
  0x16   : > { %p885_p11 = pnand %p543_p9, %p856_p1  ;;  %p638_p7 = scmp.lt.s32.totalorder %s629_s6, %s629_s6 }
  0x18   : > { %p620_p12 = pneg %p885_p11  ;;  %p639_p6 = por %p638_p7, %p637_p5 }
  0x1a   : > { %p632_p0 = pnand %p630_p13, %p620_p12 }
  0x1c   : > { %p633_p3 = pneg %p632_p0 }
  0x1e   : > { %p640_p4 = pnand %p639_p6, %p633_p3 }
  0x20   : > { %643 = shalt.err (!%p640_p4)
}
  0x21   : > { %s789_s7 = smov 64   ;;  %s790_s8 = smov 4  }
  0x22   : > { %s1042_s1 = sld [smem:[#allocation14_spill]]  ;;  %p39_p6 = scmp.ge.s32.totalorder %s37_s5, 2 }
  0x23   : > { %s46_s11 = sadd.s32 1, %s774_s17  ;;  %p53_p4 = scmp.ne.s32.totalorder %s774_s17, %s770_s16 }
  0x24   : > { %p54_p9 = scmp.eq.s32.totalorder %s786_s20, 0  ;;  %s1055_s5 = smov (%p39_p6, %s37_s5), 0 }
  0x25   : > { %p909_p13 = por %p860_p2, %p53_p4  ;;  %s41_s14 = ssub.s32 %s782_s19, %s1055_s5 }
  0x26   : > { %p903_p12 = por %p54_p9, %p53_p4  ;;  %p559_p0 = scmp.lt.s32.totalorder %s786_s20, 2 }
  0x27   : > { %s197_s21 = sand.u32 1, %s774_s17  }
  0x28   : > { %546 = dma.hbm_to_vmem [thread:$0]  (!%p885_p11), %s1042_s1, 256, %s181_s29, [#allocation6], %s789_s7, %s789_s7, %s790_s8  }
  0x29   : > { %p44_p11 = scmp.eq.s32.totalorder %s41_s14, 0  ;;  %s503_s22 = sshll.u32 %s197_s21, 3 }
  0x2a   : > { %s504_s29 = sshll.u32 %s782_s19, 7  ;;  %s201_s8 = scalar_lea.vmem [#allocation2], %s503_s22 }
  0x2b   : > { %s918_s28 = scalar_select %p44_p11, %s774_s17, %s46_s11  }
  0x2c   : > { %s207_s7 = scalar_lea.hbm %s1029_s0, %s504_s29  ;;  %s209_s9 = sshll.u32 %s201_s8, 4  ;;  %s210_s9 = int_to_ptr.vmem [resolvable:$true] %s209_s9 }
  0x2d   : > { %p926_p2 = pnand %p559_p0, %p903_p12  ;;  %s198_s10 = scalar_lea.sflag [#allocation3], %s197_s21 }
  0x2e   : > { %s657_s14 = scalar_lea.vmem %s210_s9, 128  ;;  %s791_s11 = smov [#allocation2]  }
  0x2f   : > { %p646_p3 = pneg %p926_p2  ;;  %p658_p5 = scmp.ne.s32.totalorder %s210_s9, %s657_s14 }
  0x30   : > { %s662_s1 = sshll.u32 %s791_s11, 4  ;;  %s663_s1 = int_to_ptr.vmem [resolvable:$false] %s662_s1 }
  0x31   : > { %p660_p7 = pnand %p658_p5, %p646_p3  ;;  %s664_s29 = scalar_lea.vmem %s663_s1, 256 }
  0x32   : > { %p665_p4 = scmp.lt.s32.totalorder %s210_s9, %s663_s1  ;;  %p666_p9 = scmp.lt.s32.totalorder %s664_s29, %s657_s14 }
  0x33   : > { %p661_p6 = pneg %p660_p7 }
  0x34   : > { %p667_p11 = por %p666_p9, %p665_p4 }
  0x36   : > { %p668_p10 = pnand %p667_p11, %p661_p6 }
  0x38   : > { %671 = shalt.err (!%p668_p10)
}
  0x39   : > { %550 = dma.hbm_to_vmem [thread:$0]  (!%p926_p2), %s207_s7, 128, %s210_s9, %s198_s10  }
  0x3a   : > { %218 = sbr.rel (%p876_p8) target bundleno = 400 (0x190), region = 32  ;;  %s937_s12 = sand.u32 (!%p876_p8), 1, %s770_s16  }
  0x3b   : > { %s506_s21 = sshll.u32 (!%p876_p8), %s937_s12, 3  ;;  %s221_s22 = scalar_lea.sflag (!%p876_p8), [#allocation3], %s937_s12 }
  0x3c   : > { %s224_s30 = scalar_lea.vmem (!%p876_p8), [#allocation2], %s506_s21  ;;  %p1046_p12 = scmp.ne.s32.totalorder (!%p876_p8), %s1038_s25, 0 }
  0x3f   : > { %749 = dma.done.wait (%p1046_p12), %s221_s22, 128  }
  0x40   : > { %751 = vsyncadd (%p1046_p12), %s221_s22, 4294967168 }
  0x41   : > { %753 = dma.done.wait (%p856_p1), [#allocation6], 256  }
  0x42   : > { %755 = vsyncadd (%p856_p1), [#allocation6], 4294967040  ;;  %v792_v0 = vmov 0.0   ;;  %vm793_vm0 = vmmov 0   ;;  %v616_v1 = vld [vmem:[#allocation5 + $0x8] sm:$0xff]   ;;  %v617_v2 = vld [vmem:[#allocation5] sm:$0xff]  }
  0x43   : > { %525 = vmatprep.subr.bf16.mxu0 %v792_v0  ;;  %529 = vmatprep.mubr.msk.bf16.mxu0 %vm793_vm0, %v792_v0  ;;  %v259_v3 = vld [vmem:[%s224_s30] sm:$0xff]  ;;  %vm284_vm1 = vcmask 261120   ;;  %s508_s23 = sshll.u32 %s937_s12, 2  ;;  %s517_s27 = sshll.u32 %s778_s18, 6  ;;  %vm330_vm2 = vcmask 257024  }
  0x44   : > { %526 = vmatpush3.bf16.msra.mxu0 %v616_v1  ;;  %v260_v4 = vpack.c.bf16 %v259_v3, %v259_v3  ;;  %v510_v5 = vld [vmem:[%s1031_s2] ss:$0 sm:$0xff]  ;;  %s250_s6 = scalar_lea.vmem [#allocation7], %s508_s23  ;;  %s794_s8 = smov 96  }
  0x45   : > { %527 = vmatprep.subr.bf16.mxu0 %v792_v0  ;;  %s361_s7 = sshll.u32 %s250_s6, 4  ;;  %s961_s10 = scalar_lea.hbm %s1032_s3, %s517_s27  ;;  %s362_s7 = int_to_ptr.vmem [resolvable:$true] %s361_s7 }
  0x46   : > { %s342_s14 = scalar_lea.sflag [#allocation4], %s937_s12  ;;  %s672_s11 = scalar_lea.vmem %s362_s7, 64 }
  0x47   : > { %p673_p1 = scmp.ne.s32.totalorder %s362_s7, %s672_s11  ;;  %s795_s29 = smov [#allocation7]  }
  0x48   : > { %528 = vmatpush3.bf16.msra.mxu0 %v617_v2  ;;  %s676_s21 = sshll.u32 %s795_s29, 4  ;;  %s677_s21 = int_to_ptr.vmem [resolvable:$false] %s676_s21 }
  0x49   : > { %p674_p8 = pnand %p673_p1, %p909_p13  ;;  %s678_s22 = scalar_lea.vmem %s677_s21, 128 }
  0x4a   : > { %p679_p0 = scmp.lt.s32.totalorder %s362_s7, %s677_s21  ;;  %p680_p2 = scmp.lt.s32.totalorder %s678_s22, %s672_s11 }
  0x4b   : > { %530 = vmatmul.mubr.msk.bf16.vlgmr.msra.gmra.mxu0 %vm284_vm1, %v260_v4  ;;  %p675_p10 = pneg %p674_p8 }
  0x4c   : > { %p681_p3 = por %p680_p2, %p679_p0 }
  0x4e   : > { %p682_p5 = pnand %p681_p3, %p675_p10 }
 0x10b   : > { %v322_v6 = vpop.f32.mrf.mxu0 }
 0x10c   : > { %v323_v7 = vadd.f32 %v510_v5, %v322_v6 }
 0x10d   : > { %v531_v8 = vpop.f32.mrf.mxu0 }
 0x10e   : > { %v328_v9 = vmul.f32 0.35355338, %v323_v7  ;;  %v521_v10 = vpack.c.bf16 %v323_v7, %v323_v7 }
 0x10f   : > { %v325_v11 = vpop.f32.mrf.mxu0 }
 0x110   : > { %v329_v12 = vpack.c.bf16 %v328_v9, %v328_v9  ;;  %336 = vrot.lane.b32.xlu0 %v521_v10, %s794_s8 }
 0x111   : > { %v532_v13 = vpop.f32.mrf.mxu0 }
 0x112   : > { %331 = vst.msk [vmem:[%s250_s6] sm:$0xf] %vm330_vm2, %v329_v12 }
 0x113   : > { %685 = shalt.err (!%p682_p5)
}
 0x114   : > { %s686_s30 = scalar_lea.hbm %s961_s10, 64  ;;  %s690_s6 = scalar_lea.hbm %s1032_s3, 128 }
 0x115   : > { %p687_p7 = scmp.ne.s32.totalorder %s961_s10, %s686_s30  ;;  %p691_p9 = scmp.lt.s32.totalorder %s961_s10, %s1032_s3 }
 0x116   : > { %p692_p11 = scmp.lt.s32.totalorder %s690_s6, %s686_s30 }
 0x117   : > { %p688_p6 = pnand %p687_p7, %p909_p13 }
 0x118   : > { %p693_p12 = por %p692_p11, %p691_p9 }
 0x119   : > { %p689_p4 = pneg %p688_p6 }
 0x11b   : > { %p694_p1 = pnand %p693_p12, %p689_p4 }
 0x11d   : > { %697 = shalt.err (!%p694_p1)
}
 0x11e   : > { %539 = dma.vmem_to_hbm [thread:$0]  (%p909_p13), %s362_s7, 64, %s961_s10, %s342_s14   ;;  %vm339_vm3 = vcmask 125952  }
 0x11f   : > { %s257_s24 = scalar_lea.vmem [#allocation8], %s508_s23  ;;  %s987_s22 = scalar_lea.hbm %s1033_s4, %s517_s27 }
 0x120   : > { %s375_s11 = sshll.u32 %s257_s24, 4  ;;  %s347_s30 = scalar_lea.sflag [#allocation9], %s937_s12  ;;  %s376_s11 = int_to_ptr.vmem [resolvable:$true] %s375_s11 }
 0x121   : > { %s698_s1 = scalar_lea.vmem %s376_s11, 64  ;;  %s796_s7 = smov [#allocation8]  }
 0x122   : > { %p699_p8 = scmp.ne.s32.totalorder %s376_s11, %s698_s1  ;;  %s702_s10 = sshll.u32 %s796_s7, 4  ;;  %s703_s10 = int_to_ptr.vmem [resolvable:$false] %s702_s10 }
 0x123   : > { %s704_s23 = scalar_lea.vmem %s703_s10, 128  ;;  %p705_p2 = scmp.lt.s32.totalorder %s376_s11, %s703_s10 }
 0x124   : > { %p700_p10 = pnand %p699_p8, %p909_p13  ;;  %p706_p3 = scmp.lt.s32.totalorder %s704_s23, %s698_s1 }
 0x126   : > { %p701_p0 = pneg %p700_p10  ;;  %p707_p5 = por %p706_p3, %p705_p2 }
 0x128   : > { %p708_p7 = pnand %p707_p5, %p701_p0 }
 0x182   : > { %v337_v14 = vpop.permute.xlu0 %336 }
 0x183   : > { %340 = vst.msk [vmem:[%s257_s24] sm:$0xf] %vm339_vm3, %v337_v14 }
 0x184   : > { %711 = shalt.err (!%p708_p7)
}
 0x185   : > { %s712_s18 = scalar_lea.hbm %s987_s22, 64  ;;  %s716_s14 = scalar_lea.hbm %s1033_s4, 128 }
 0x186   : > { %p713_p6 = scmp.ne.s32.totalorder %s987_s22, %s712_s18  ;;  %p717_p11 = scmp.lt.s32.totalorder %s987_s22, %s1033_s4 }
 0x187   : > { %p718_p12 = scmp.lt.s32.totalorder %s716_s14, %s712_s18 }
 0x188   : > { %p714_p4 = pnand %p713_p6, %p909_p13 }
 0x189   : > { %p719_p1 = por %p718_p12, %p717_p11 }
 0x18a   : > { %p715_p9 = pneg %p714_p4 }
 0x18c   : > { %p720_p8 = pnand %p719_p1, %p715_p9 }
 0x18e   : > { %723 = shalt.err (!%p720_p8)
}
 0x18f   : > { %540 = dma.vmem_to_hbm [thread:$0]  (%p909_p13), %s376_s11, 64, %s987_s22, %s347_s30  }
 0x190 PF: > { %s387_s8 = sand.u32 1, %s766_s15   ;;  %p1047_p10 = scmp.ne.s32.totalorder %s1039_s26, 0 }
 0x191   : > { %p1048_p0 = scmp.ge.s32.totalorder %s786_s20, 2  ;;  %s388_s9 = scalar_lea.sflag [#allocation4], %s387_s8 }
 0x193   : > { %p552_p2 = pnand %p1048_p0, %p1047_p10 }
 0x195   : > { %p553_p3 = pneg %p552_p2 }
 0x197   : > { %757 = dma.done.wait (%p553_p3), %s388_s9, 64  }
 0x198   : > { %759 = vsyncadd (%p553_p3), %s388_s9, 4294967232  ;;  %s397_s24 = scalar_lea.sflag [#allocation9], %s387_s8 }
 0x199   : > { %761 = dma.done.wait (%p553_p3), %s397_s24, 64  }
 0x19a   : > { %763 = vsyncadd (%p553_p3), %s397_s24, 4294967232  ;;  %s25_s20 = sadd.s32 1, %s786_s20   ;;  %s1049_s15 = smov %s770_s16 }
 0x19b   : > { %p22_p5 = scmp.ge.s32.totalorder %s25_s20, 4   ;;  %s1050_s16 = smov %s774_s17 }
 0x19c   : > { %s1051_s17 = smov %s918_s28  ;;  %s1052_s18 = smov %s782_s19 }
 0x19d   : > { %s1053_s19 = smov %s1055_s5  ;;  %24 = sbr.rel (!%p22_p5) target bundleno = 11 (0xb), region = 98 }
 0x1a2   :  { %402 = vsyncpa [#allocation3], 1 }
 0x1a3   :  { %404 = vsyncpa [#allocation3 + $0x1], 1 }
 0x1a4   :  { %405 = vsyncpa [#allocation6], 1 }
 0x1a5   :  { %406 = vsyncpa [#allocation4], 1 }
 0x1a6   :  { %408 = vsyncpa [#allocation4 + $0x1], 1 }
 0x1a7   :  { %409 = vsyncpa [#allocation9], 1 }
 0x1a8   :  { %411 = vsyncpa [#allocation9 + $0x1], 1 }

</bundles_post_ra>
